<compile_context>
chip_gen: v6e
topology: v6e:2x2x1
jax: 0.10.0
libtpu: 0.0.40
codegen_flags: <defaults>
</compile_context>

<pallas_src>
import functools

import jax
import jax.numpy as jnp
import numpy as np
from jax.experimental import pallas as pl
from jax.experimental.pallas import tpu as pltpu

EPS = 1e-5          # torch.nn.GroupNorm default
_LANES = 128        # slab lane width (one full lane group -> native rolls)


def _round_up(x, m):
    return ((x + m - 1) // m) * m


def _pick_samples_per_step(n):
    """Samples per grid step: keep >=2 steps (v7x megacore) while batching."""
    if n <= 2:
        return 1
    nb = min(n // 2, 16)
    while nb > 1 and n % nb != 0:
        nb -= 1
    return nb


# ---------------------------------------------------------------------------
# Kernel: one grid step processes NB batch samples
# ---------------------------------------------------------------------------
def daab_kernel(x_ref, gb_ref, pq_ref, pqt_ref, w_ref, o_ref, slab_ref,
                *, C, H, W, M, NB, SEP):
    f32 = jnp.float32
    R, NC = slab_ref.shape                      # padded slab (rows, 128)
    OFF_H = W + SEP                             # img_h column offset in slab
    OFF_W = OFF_H + W + SEP                     # img_w (stored (C,H)) offset
    BW = W + SEP + H                            # width of [img_h | 0 | img_w]

    # ---- constants & weights, hoisted out of the per-sample loop -----------
    gamma = gb_ref[:, 0:1]                      # (C, 1) f32
    beta = gb_ref[:, 1:2]                       # (C, 1) f32
    pq = pq_ref[...]                            # (HW, BW)  [P/H | 0 | Q/W]
    pqt = pqt_ref[...]                          # (BW, HW)  [P^T ; 0 ; Q^T]
    PT = pqt_ref[0:W, :]                        # (W, HW)  0/1 selection
    QT = pqt_ref[OFF_H:OFF_H + H, :]            # (H, HW)  0/1 selection

    lane = jax.lax.broadcasted_iota(jnp.int32, (1, NC), 1)
    # Columns holding the (C,H)-oriented img_w region -> transposed 3x3 taps.
    mask_w = ((lane >= OFF_W) & (lane < OFF_W + H)).astype(f32)

    def conv_du_on_slab(slab):
        """wn 3x3 conv -> ReLU -> wn 1x1 conv -> sigmoid, applied to all three
        branch images packed in `slab`.  +-1 shifts are XLU rolls; the conv's
        zero padding is supplied by the zero separator columns / padding rows
        that wrap around, so no MXU shift matmuls and no edge masks."""
        accs = [jnp.zeros((R, NC), f32) for _ in range(M)]
        for a in range(3):                       # tap row offset dr = a - 1
            if a == 0:
                rs = pltpu.roll(slab, 1, axis=0)          # read row i-1
            elif a == 1:
                rs = slab
            else:
                rs = pltpu.roll(slab, R - 1, axis=0)      # read row i+1
            for b in range(3):                   # tap col offset dc = b - 1
                if b == 0:
                    tap = pltpu.roll(rs, 1, axis=1)       # read col j-1
                elif b == 1:
                    tap = rs
                else:
                    tap = pltpu.roll(rs, NC - 1, axis=1)  # read col j+1
                k_std = a * 3 + b
                k_swp = b * 3 + a
                for m in range(M):
                    w_std = w_ref[m * 9 + k_std]
                    if k_std == k_swp:
                        wk = w_std
                    else:   # img_w region is stored transposed -> swapped tap
                        wk = w_std + (w_ref[m * 9 + k_swp] - w_std) * mask_w
                    accs[m] = accs[m] + wk * tap
        out = jnp.zeros((R, NC), f32)
        for m in range(M):
            out = out + w_ref[9 * M + m] * jnp.maximum(accs[m], 0.0)
        return jax.nn.sigmoid(out)

    for s in range(NB):                          # static loop: NB samples/step
        x = x_ref[s].astype(f32)                 # (C, HW)

        # --- GroupNorm(C, C): per-channel stats over H*W, affine hoisted.
        mean = jnp.mean(x, axis=1, keepdims=True)
        var = jnp.mean(jnp.square(x - mean), axis=1, keepdims=True)
        scale = gamma * jax.lax.rsqrt(var + EPS)
        shift = beta - mean * scale
        xn = x * scale + shift                   # (C, HW)

        # --- branch images via lane-selection matmuls (one MXU op each).
        imgs = jnp.dot(xn, pq, preferred_element_type=f32)      # (C, BW) = [mean_H | 0 | mean_W]
        csum = jnp.sum(xn, axis=0, keepdims=True) * (H / C)     # (1, HW) sublane reduce
        cproj = jnp.dot(QT * csum, pq,
                        preferred_element_type=f32)             # (H, BW); [:, :W] = mean_C image

        # --- pack the three images into one lane-dense slab.
        slab_ref[...] = jnp.zeros((R, NC), f32)
        slab_ref[0:H, 0:W] = cproj[:, 0:W]                      # img_c  (H, W)
        slab_ref[0:C, OFF_H:OFF_H + BW] = imgs                  # img_h | 0 | img_w(C,H)

        att = conv_du_on_slab(slab_ref[...])                    # (R, NC)
        slab_ref[...] = att

        a_c = slab_ref[0:H, 0:W]                                # (H, W)
        a_hw = slab_ref[0:C, OFF_H:OFF_H + BW]                  # (C, BW)

        # --- broadcast attentions back to (C, HW) and combine:
        #     y = sigmoid(xn * (1 + a_c[h,w] + a_h[c,w] + a_w[h,c])).
        A_hw = jnp.dot(a_hw, pqt, preferred_element_type=f32)   # a_h[c,l%W] + a_w[c,l//W]
        A_c = jnp.sum(QT * jnp.dot(a_c, PT, preferred_element_type=f32),
                      axis=0, keepdims=True)                    # (1, HW)

        y = xn * (1.0 + A_c + A_hw)
        o_ref[s] = jax.nn.sigmoid(y).astype(o_ref.dtype)


# ---------------------------------------------------------------------------
# Wrapper
# ---------------------------------------------------------------------------
def _weight_norm(v, g):
    """PyTorch weight_norm (dim=0): w = g * v / ||v||, norm over all dims but 0."""
    norm = jnp.sqrt(jnp.sum(v * v, axis=tuple(range(1, v.ndim)), keepdims=True))
    return (g.reshape((-1,) + (1,) * (v.ndim - 1)) / norm) * v


@jax.jit
def daab_forward(x, gamma, beta, v1, g1, v2, g2):
    N, C, H, W = x.shape
    HW = H * W
    M = v1.shape[0]                               # n_channels // reduction

    SEP = _round_up(W + 1, 8) - W                 # zero cols after each image
    OFF_W = 2 * (W + SEP)
    if OFF_W + H >= _LANES:
        # TODO(synk): support slabs wider than one 128-lane group (large H/W).
        raise NotImplementedError("DAAB Pallas kernel assumes 2*W + H + seps <= 127")
    R = _round_up(max(H, C) + 1, 8)               # slab rows incl. >=1 zero pad row
    BW = W + SEP + H

    # weight-normed conv weights, flattened for SMEM scalar access
    w1 = _weight_norm(v1, g1).reshape(M, 9)       # [m, kh*3 + kw]
    w2 = _weight_norm(v2, g2).reshape(M)
    w_flat = jnp.concatenate([w1.reshape(-1), w2], axis=0).astype(jnp.float32)

    # Host-built constant selection matrices (constant index_map -> fetched
    # once, VMEM-resident across all grid steps).
    l = np.arange(HW)
    P01 = (l[:, None] % W == np.arange(W)[None, :]).astype(np.float32)   # (HW, W)
    Q01 = (l[:, None] // W == np.arange(H)[None, :]).astype(np.float32)  # (HW, H)
    pq = jnp.asarray(np.concatenate(
        [P01 / H, np.zeros((HW, SEP), np.float32), Q01 / W], axis=1))    # (HW, BW)
    pqt = jnp.asarray(np.concatenate(
        [P01.T, np.zeros((SEP, HW), np.float32), Q01.T], axis=0))        # (BW, HW)

    gb = jnp.stack([gamma, beta], axis=1).astype(jnp.float32)            # (C, 2) keep f32

    NB = _pick_samples_per_step(N)
    grid = (N // NB,)

    x2 = x.reshape(N, C, HW)

    out = pl.pallas_call(
        functools.partial(daab_kernel, C=C, H=H, W=W, M=M, NB=NB, SEP=SEP),
        out_shape=jax.ShapeDtypeStruct((N, C, HW), x.dtype),
        grid_spec=pltpu.PrefetchScalarGridSpec(
            num_scalar_prefetch=0,
            grid=grid,
            in_specs=[
                pl.BlockSpec((NB, C, HW), lambda n: (n, 0, 0)),      # x (NB samples/step)
                pl.BlockSpec((C, 2), lambda n: (0, 0)),              # gamma|beta (f32)
                pl.BlockSpec((HW, BW), lambda n: (0, 0)),            # [P/H | 0 | Q/W]
                pl.BlockSpec((BW, HW), lambda n: (0, 0)),            # [P^T ; 0 ; Q^T]
                pl.BlockSpec(memory_space=pltpu.MemorySpace.SMEM),   # conv weights
            ],
            out_specs=pl.BlockSpec((NB, C, HW), lambda n: (n, 0, 0)),
            scratch_shapes=[pltpu.VMEM((R, _LANES), jnp.float32)],   # branch-image slab
        ),
        compiler_params=pltpu.CompilerParams(
            dimension_semantics=("parallel",)),
    )(x2, gb, pq, pqt, w_flat)

    return out.reshape(N, C, H, W)


# ---------------------------------------------------------------------------
# Pure-JAX reference (for correctness check)
# ---------------------------------------------------------------------------
def daab_reference(x, gamma, beta, v1, g1, v2, g2):
    N, C, H, W = x.shape
    w1 = _weight_norm(v1, g1)
    w2 = _weight_norm(v2, g2)

    mean = x.mean(axis=(2, 3), keepdims=True)
    var = ((x - mean) ** 2).mean(axis=(2, 3), keepdims=True)
    xn = (x - mean) / jnp.sqrt(var + EPS)
    xn = xn * gamma.reshape(1, C, 1, 1) + beta.reshape(1, C, 1, 1)

    def conv_du(img):   # img: (N, 1, R, S)
        h = jax.lax.conv_general_dilated(
            img, w1, (1, 1), ((1, 1), (1, 1)),
            dimension_numbers=("NCHW", "OIHW", "NCHW"))
        h = jnp.maximum(h, 0.0)
        h = jax.lax.conv_general_dilated(
            h, w2, (1, 1), ((0, 0), (0, 0)),
            dimension_numbers=("NCHW", "OIHW", "NCHW"))
        return jax.nn.sigmoid(h)

    second_c = conv_du(xn.mean(axis=1, keepdims=True)) * xn

    xh = jnp.transpose(xn, (0, 2, 1, 3))                      # (N, H, C, W)
    second_h = conv_du(xh.mean(axis=1, keepdims=True)) * xh
    second_h = jnp.transpose(second_h, (0, 2, 1, 3))

    xw = jnp.transpose(xn, (0, 3, 2, 1))                      # (N, W, H, C)
    second_w = conv_du(xw.mean(axis=1, keepdims=True)) * xw
    second_w = jnp.transpose(second_w, (0, 3, 2, 1))

    return jax.nn.sigmoid(second_c + second_h + second_w + xn)


if __name__ == "__main__":
    # DAAB(wn, n_channels=8, reduction=4)
    N, C, H, W = 2, 8, 16, 16
    reduction = 4
    M = C // reduction

    key = jax.random.PRNGKey(0)
    kx, kg, kb, k1, k2 = jax.random.split(key, 5)

    x = jax.random.normal(kx, (N, C, H, W), jnp.float32)
    gamma = 1.0 + 0.1 * jax.random.normal(kg, (C,), jnp.float32)
    beta = 0.1 * jax.random.normal(kb, (C,), jnp.float32)

    # weight_norm reparameterization (v, g); g init = ||v|| (PyTorch init).
    v1 = 0.3 * jax.random.normal(k1, (M, 1, 3, 3), jnp.float32)
    g1 = jnp.sqrt(jnp.sum(v1 * v1, axis=(1, 2, 3)))
    v2 = 0.3 * jax.random.normal(k2, (1, M, 1, 1), jnp.float32)
    g2 = jnp.sqrt(jnp.sum(v2 * v2, axis=(1, 2, 3)))

    out = jax.block_until_ready(daab_forward(x, gamma, beta, v1, g1, v2, g2))

    ref = daab_reference(x, gamma, beta, v1, g1, v2, g2)
    np.testing.assert_allclose(np.asarray(out), np.asarray(ref),
                               rtol=3e-4, atol=2e-5)

    print("KERNEL_OK")
</pallas_src>

<mosaic_0001>
module attributes {stable_mosaic.version = 11 : i64} {
  func.func @daab_kernel(%arg0: i32, %arg1: memref<1x8x256xf32, #tpu.memory_space<vmem>>, %arg2: memref<8x2xf32, #tpu.memory_space<vmem>>, %arg3: memref<256x40xf32, #tpu.memory_space<vmem>>, %arg4: memref<40x256xf32, #tpu.memory_space<vmem>>, %arg5: memref<20xf32, #tpu.memory_space<smem>>, %arg6: memref<1x8x256xf32, #tpu.memory_space<vmem>>, %arg7: memref<24x128xf32, #tpu.memory_space<vmem>>) attributes {dimension_semantics = [#tpu.dimension_semantics<parallel>], iteration_bounds = array<i64: 2>, scalar_prefetch = 0 : i64, scratch_operands = 1 : i64, tpu.core_type = #tpu.core_type<tc>, window_params = [{transform_indices = @transform_0, window_bounds = array<i64: 1, 8, 256>}, {pipeline_mode = #tpu.pipeline_mode<synchronous>, transform_indices = @transform_1, window_bounds = array<i64: 8, 2>}, {pipeline_mode = #tpu.pipeline_mode<synchronous>, transform_indices = @transform_2, window_bounds = array<i64: 256, 40>}, {pipeline_mode = #tpu.pipeline_mode<synchronous>, transform_indices = @transform_3, window_bounds = array<i64: 40, 256>}, {transform_indices = @transform_4, window_bounds = array<i64: 20>}, {transform_indices = @transform_5, window_bounds = array<i64: 1, 8, 256>}]} {
    %c0 = arith.constant 0 : index
    %c0_0 = arith.constant 0 : index
    %0 = vector.load %arg2[%c0, %c0_0] : memref<8x2xf32, #tpu.memory_space<vmem>>, vector<8x1xf32>
    %c0_1 = arith.constant 0 : index
    %c1 = arith.constant 1 : index
    %1 = vector.load %arg2[%c0_1, %c1] : memref<8x2xf32, #tpu.memory_space<vmem>>, vector<8x1xf32>
    %c0_2 = arith.constant 0 : index
    %c0_3 = arith.constant 0 : index
    %2 = vector.load %arg3[%c0_2, %c0_3] : memref<256x40xf32, #tpu.memory_space<vmem>>, vector<256x40xf32>
    %c0_4 = arith.constant 0 : index
    %c0_5 = arith.constant 0 : index
    %3 = vector.load %arg4[%c0_4, %c0_5] : memref<40x256xf32, #tpu.memory_space<vmem>>, vector<40x256xf32>
    %c0_6 = arith.constant 0 : index
    %c0_7 = arith.constant 0 : index
    %4 = vector.load %arg4[%c0_6, %c0_7] : memref<40x256xf32, #tpu.memory_space<vmem>>, vector<16x256xf32>
    %c24 = arith.constant 24 : index
    %c0_8 = arith.constant 0 : index
    %5 = vector.load %arg4[%c24, %c0_8] : memref<40x256xf32, #tpu.memory_space<vmem>>, vector<16x256xf32>
    %6 = tpu.iota {dimensions = array<i32: 1>} : vector<1x128xi32>
    %c48_i32 = arith.constant 48 : i32
    %7 = vector.broadcast %c48_i32 : i32 to vector<1x128xi32>
    %8 = arith.cmpi sge, %6, %7 : vector<1x128xi32>
    %c64_i32 = arith.constant 64 : i32
    %9 = vector.broadcast %c64_i32 : i32 to vector<1x128xi32>
    %10 = arith.cmpi slt, %6, %9 : vector<1x128xi32>
    %11 = arith.andi %8, %10 : vector<1x128xi1>
    %12 = arith.extui %11 : vector<1x128xi1> to vector<1x128xi32>
    %13 = arith.sitofp %12 : vector<1x128xi32> to vector<1x128xf32>
    %c0_9 = arith.constant 0 : index
    %c0_10 = arith.constant 0 : index
    %c0_11 = arith.constant 0 : index
    %14 = vector.load %arg1[%c0_9, %c0_10, %c0_11] : memref<1x8x256xf32, #tpu.memory_space<vmem>>, vector<1x8x256xf32>
    %15 = vector.shape_cast %14 : vector<1x8x256xf32> to vector<8x256xf32>
    %cst = arith.constant dense<0.000000e+00> : vector<8xf32>
    %16 = vector.multi_reduction <add>, %15, %cst [1] : vector<8x256xf32> to vector<8xf32>
    %17 = vector.shape_cast %16 : vector<8xf32> to vector<8x1xf32>
    %cst_12 = arith.constant 2.560000e+02 : f32
    %18 = vector.broadcast %cst_12 : f32 to vector<8x1xf32>
    %19 = arith.divf %17, %18 : vector<8x1xf32>
    %20 = vector.broadcast %19 : vector<8x1xf32> to vector<8x256xf32>
    %21 = arith.subf %15, %20 : vector<8x256xf32>
    %22 = arith.mulf %21, %21 : vector<8x256xf32>
    %cst_13 = arith.constant dense<0.000000e+00> : vector<8xf32>
    %23 = vector.multi_reduction <add>, %22, %cst_13 [1] : vector<8x256xf32> to vector<8xf32>
    %24 = vector.shape_cast %23 : vector<8xf32> to vector<8x1xf32>
    %cst_14 = arith.constant 2.560000e+02 : f32
    %25 = vector.broadcast %cst_14 : f32 to vector<8x1xf32>
    %26 = arith.divf %24, %25 : vector<8x1xf32>
    %cst_15 = arith.constant 9.99999974E-6 : f32
    %27 = vector.broadcast %cst_15 : f32 to vector<8x1xf32>
    %28 = arith.addf %26, %27 : vector<8x1xf32>
    %29 = math.rsqrt %28 : vector<8x1xf32>
    %30 = arith.mulf %0, %29 : vector<8x1xf32>
    %31 = arith.mulf %19, %30 : vector<8x1xf32>
    %32 = arith.subf %1, %31 : vector<8x1xf32>
    %33 = vector.broadcast %30 : vector<8x1xf32> to vector<8x256xf32>
    %34 = arith.mulf %15, %33 : vector<8x256xf32>
    %35 = vector.broadcast %32 : vector<8x1xf32> to vector<8x256xf32>
    %36 = arith.addf %34, %35 : vector<8x256xf32>
    %cst_16 = arith.constant dense<0.000000e+00> : vector<8x40xf32>
    %37 = tpu.matmul %36, %2, %cst_16 {dimension_numbers = #tpu.dot_dimension_numbers<[1], [0], [0], [1], [0, 0, 1, 1], [], []>} : vector<8x256xf32>, vector<256x40xf32>, vector<8x40xf32> -> vector<8x40xf32>
    %cst_17 = arith.constant dense<0.000000e+00> : vector<256xf32>
    %38 = vector.multi_reduction <add>, %36, %cst_17 [0] : vector<8x256xf32> to vector<256xf32>
    %39 = vector.shape_cast %38 : vector<256xf32> to vector<1x256xf32>
    %cst_18 = arith.constant 2.000000e+00 : f32
    %40 = vector.broadcast %cst_18 : f32 to vector<1x256xf32>
    %41 = arith.mulf %39, %40 : vector<1x256xf32>
    %42 = vector.broadcast %41 : vector<1x256xf32> to vector<16x256xf32>
    %43 = arith.mulf %5, %42 : vector<16x256xf32>
    %cst_19 = arith.constant dense<0.000000e+00> : vector<16x40xf32>
    %44 = tpu.matmul %43, %2, %cst_19 {dimension_numbers = #tpu.dot_dimension_numbers<[1], [0], [0], [1], [0, 0, 1, 1], [], []>} : vector<16x256xf32>, vector<256x40xf32>, vector<16x40xf32> -> vector<16x40xf32>
    %cst_20 = arith.constant 0.000000e+00 : f32
    %45 = vector.broadcast %cst_20 : f32 to vector<24x128xf32>
    %c0_21 = arith.constant 0 : index
    %c0_22 = arith.constant 0 : index
    %46 = vector.load %arg7[%c0_21, %c0_22] : memref<24x128xf32, #tpu.memory_space<vmem>>, vector<24x128xf32>
    tpu.vector_store %arg7[%c0_21, %c0_22], %45 {strides = array<i32>} : memref<24x128xf32, #tpu.memory_space<vmem>>, vector<24x128xf32>,
    %47 = vector.extract_strided_slice %44 {offsets = [0, 0], sizes = [16, 16], strides = [1, 1]} : vector<16x40xf32> to vector<16x16xf32>
    %c0_23 = arith.constant 0 : index
    %c0_24 = arith.constant 0 : index
    %48 = vector.load %arg7[%c0_23, %c0_24] : memref<24x128xf32, #tpu.memory_space<vmem>>, vector<16x16xf32>
    tpu.vector_store %arg7[%c0_23, %c0_24], %47 {strides = array<i32>} : memref<24x128xf32, #tpu.memory_space<vmem>>, vector<16x16xf32>,
    %c0_25 = arith.constant 0 : index
    %c24_26 = arith.constant 24 : index
    %49 = vector.load %arg7[%c0_25, %c24_26] : memref<24x128xf32, #tpu.memory_space<vmem>>, vector<8x40xf32>
    tpu.vector_store %arg7[%c0_25, %c24_26], %37 {strides = array<i32>} : memref<24x128xf32, #tpu.memory_space<vmem>>, vector<8x40xf32>,
    %c0_27 = arith.constant 0 : index
    %c0_28 = arith.constant 0 : index
    %50 = vector.load %arg7[%c0_27, %c0_28] : memref<24x128xf32, #tpu.memory_space<vmem>>, vector<24x128xf32>
    %cst_29 = arith.constant 0.000000e+00 : f32
    %51 = vector.broadcast %cst_29 : f32 to vector<24x128xf32>
    %cst_30 = arith.constant 0.000000e+00 : f32
    %52 = vector.broadcast %cst_30 : f32 to vector<24x128xf32>
    %c1_i32 = arith.constant 1 : i32
    %53 = tpu.dynamic_rotate %50 by %c1_i32 dim 0 : vector<24x128xf32>, i32 -> vector<24x128xf32>
    %c1_i32_31 = arith.constant 1 : i32
    %54 = tpu.dynamic_rotate %53 by %c1_i32_31 dim 1 : vector<24x128xf32>, i32 -> vector<24x128xf32>
    %c0_32 = arith.constant 0 : index
    %55 = memref.load %arg5[%c0_32] : memref<20xf32, #tpu.memory_space<smem>>
    %56 = vector.broadcast %55 : f32 to vector<24x128xf32>
    %57 = arith.mulf %56, %54 : vector<24x128xf32>
    %58 = arith.addf %51, %57 : vector<24x128xf32>
    %c9 = arith.constant 9 : index
    %59 = memref.load %arg5[%c9] : memref<20xf32, #tpu.memory_space<smem>>
    %60 = vector.broadcast %59 : f32 to vector<24x128xf32>
    %61 = arith.mulf %60, %54 : vector<24x128xf32>
    %62 = arith.addf %52, %61 : vector<24x128xf32>
    %c1_33 = arith.constant 1 : index
    %63 = memref.load %arg5[%c1_33] : memref<20xf32, #tpu.memory_space<smem>>
    %c3 = arith.constant 3 : index
    %64 = memref.load %arg5[%c3] : memref<20xf32, #tpu.memory_space<smem>>
    %65 = arith.subf %64, %63 : f32
    %66 = vector.broadcast %65 : f32 to vector<1x128xf32>
    %67 = arith.mulf %66, %13 : vector<1x128xf32>
    %68 = vector.broadcast %63 : f32 to vector<1x128xf32>
    %69 = arith.addf %68, %67 : vector<1x128xf32>
    %70 = vector.broadcast %69 : vector<1x128xf32> to vector<24x128xf32>
    %71 = arith.mulf %70, %53 : vector<24x128xf32>
    %72 = arith.addf %58, %71 : vector<24x128xf32>
    %c10 = arith.constant 10 : index
    %73 = memref.load %arg5[%c10] : memref<20xf32, #tpu.memory_space<smem>>
    %c12 = arith.constant 12 : index
    %74 = memref.load %arg5[%c12] : memref<20xf32, #tpu.memory_space<smem>>
    %75 = arith.subf %74, %73 : f32
    %76 = vector.broadcast %75 : f32 to vector<1x128xf32>
    %77 = arith.mulf %76, %13 : vector<1x128xf32>
    %78 = vector.broadcast %73 : f32 to vector<1x128xf32>
    %79 = arith.addf %78, %77 : vector<1x128xf32>
    %80 = vector.broadcast %79 : vector<1x128xf32> to vector<24x128xf32>
    %81 = arith.mulf %80, %53 : vector<24x128xf32>
    %82 = arith.addf %62, %81 : vector<24x128xf32>
    %c127_i32 = arith.constant 127 : i32
    %83 = tpu.dynamic_rotate %53 by %c127_i32 dim 1 : vector<24x128xf32>, i32 -> vector<24x128xf32>
    %c2 = arith.constant 2 : index
    %84 = memref.load %arg5[%c2] : memref<20xf32, #tpu.memory_space<smem>>
    %c6 = arith.constant 6 : index
    %85 = memref.load %arg5[%c6] : memref<20xf32, #tpu.memory_space<smem>>
    %86 = arith.subf %85, %84 : f32
    %87 = vector.broadcast %86 : f32 to vector<1x128xf32>
    %88 = arith.mulf %87, %13 : vector<1x128xf32>
    %89 = vector.broadcast %84 : f32 to vector<1x128xf32>
    %90 = arith.addf %89, %88 : vector<1x128xf32>
    %91 = vector.broadcast %90 : vector<1x128xf32> to vector<24x128xf32>
    %92 = arith.mulf %91, %83 : vector<24x128xf32>
    %93 = arith.addf %72, %92 : vector<24x128xf32>
    %c11 = arith.constant 11 : index
    %94 = memref.load %arg5[%c11] : memref<20xf32, #tpu.memory_space<smem>>
    %c15 = arith.constant 15 : index
    %95 = memref.load %arg5[%c15] : memref<20xf32, #tpu.memory_space<smem>>
    %96 = arith.subf %95, %94 : f32
    %97 = vector.broadcast %96 : f32 to vector<1x128xf32>
    %98 = arith.mulf %97, %13 : vector<1x128xf32>
    %99 = vector.broadcast %94 : f32 to vector<1x128xf32>
    %100 = arith.addf %99, %98 : vector<1x128xf32>
    %101 = vector.broadcast %100 : vector<1x128xf32> to vector<24x128xf32>
    %102 = arith.mulf %101, %83 : vector<24x128xf32>
    %103 = arith.addf %82, %102 : vector<24x128xf32>
    %c1_i32_34 = arith.constant 1 : i32
    %104 = tpu.dynamic_rotate %50 by %c1_i32_34 dim 1 : vector<24x128xf32>, i32 -> vector<24x128xf32>
    %c3_35 = arith.constant 3 : index
    %105 = memref.load %arg5[%c3_35] : memref<20xf32, #tpu.memory_space<smem>>
    %c1_36 = arith.constant 1 : index
    %106 = memref.load %arg5[%c1_36] : memref<20xf32, #tpu.memory_space<smem>>
    %107 = arith.subf %106, %105 : f32
    %108 = vector.broadcast %107 : f32 to vector<1x128xf32>
    %109 = arith.mulf %108, %13 : vector<1x128xf32>
    %110 = vector.broadcast %105 : f32 to vector<1x128xf32>
    %111 = arith.addf %110, %109 : vector<1x128xf32>
    %112 = vector.broadcast %111 : vector<1x128xf32> to vector<24x128xf32>
    %113 = arith.mulf %112, %104 : vector<24x128xf32>
    %114 = arith.addf %93, %113 : vector<24x128xf32>
    %c12_37 = arith.constant 12 : index
    %115 = memref.load %arg5[%c12_37] : memref<20xf32, #tpu.memory_space<smem>>
    %c10_38 = arith.constant 10 : index
    %116 = memref.load %arg5[%c10_38] : memref<20xf32, #tpu.memory_space<smem>>
    %117 = arith.subf %116, %115 : f32
    %118 = vector.broadcast %117 : f32 to vector<1x128xf32>
    %119 = arith.mulf %118, %13 : vector<1x128xf32>
    %120 = vector.broadcast %115 : f32 to vector<1x128xf32>
    %121 = arith.addf %120, %119 : vector<1x128xf32>
    %122 = vector.broadcast %121 : vector<1x128xf32> to vector<24x128xf32>
    %123 = arith.mulf %122, %104 : vector<24x128xf32>
    %124 = arith.addf %103, %123 : vector<24x128xf32>
    %c4 = arith.constant 4 : index
    %125 = memref.load %arg5[%c4] : memref<20xf32, #tpu.memory_space<smem>>
    %126 = vector.broadcast %125 : f32 to vector<24x128xf32>
    %127 = arith.mulf %126, %50 : vector<24x128xf32>
    %128 = arith.addf %114, %127 : vector<24x128xf32>
    %c13 = arith.constant 13 : index
    %129 = memref.load %arg5[%c13] : memref<20xf32, #tpu.memory_space<smem>>
    %130 = vector.broadcast %129 : f32 to vector<24x128xf32>
    %131 = arith.mulf %130, %50 : vector<24x128xf32>
    %132 = arith.addf %124, %131 : vector<24x128xf32>
    %c127_i32_39 = arith.constant 127 : i32
    %133 = tpu.dynamic_rotate %50 by %c127_i32_39 dim 1 : vector<24x128xf32>, i32 -> vector<24x128xf32>
    %c5 = arith.constant 5 : index
    %134 = memref.load %arg5[%c5] : memref<20xf32, #tpu.memory_space<smem>>
    %c7 = arith.constant 7 : index
    %135 = memref.load %arg5[%c7] : memref<20xf32, #tpu.memory_space<smem>>
    %136 = arith.subf %135, %134 : f32
    %137 = vector.broadcast %136 : f32 to vector<1x128xf32>
    %138 = arith.mulf %137, %13 : vector<1x128xf32>
    %139 = vector.broadcast %134 : f32 to vector<1x128xf32>
    %140 = arith.addf %139, %138 : vector<1x128xf32>
    %141 = vector.broadcast %140 : vector<1x128xf32> to vector<24x128xf32>
    %142 = arith.mulf %141, %133 : vector<24x128xf32>
    %143 = arith.addf %128, %142 : vector<24x128xf32>
    %c14 = arith.constant 14 : index
    %144 = memref.load %arg5[%c14] : memref<20xf32, #tpu.memory_space<smem>>
    %c16 = arith.constant 16 : index
    %145 = memref.load %arg5[%c16] : memref<20xf32, #tpu.memory_space<smem>>
    %146 = arith.subf %145, %144 : f32
    %147 = vector.broadcast %146 : f32 to vector<1x128xf32>
    %148 = arith.mulf %147, %13 : vector<1x128xf32>
    %149 = vector.broadcast %144 : f32 to vector<1x128xf32>
    %150 = arith.addf %149, %148 : vector<1x128xf32>
    %151 = vector.broadcast %150 : vector<1x128xf32> to vector<24x128xf32>
    %152 = arith.mulf %151, %133 : vector<24x128xf32>
    %153 = arith.addf %132, %152 : vector<24x128xf32>
    %c23_i32 = arith.constant 23 : i32
    %154 = tpu.dynamic_rotate %50 by %c23_i32 dim 0 : vector<24x128xf32>, i32 -> vector<24x128xf32>
    %c1_i32_40 = arith.constant 1 : i32
    %155 = tpu.dynamic_rotate %154 by %c1_i32_40 dim 1 : vector<24x128xf32>, i32 -> vector<24x128xf32>
    %c6_41 = arith.constant 6 : index
    %156 = memref.load %arg5[%c6_41] : memref<20xf32, #tpu.memory_space<smem>>
    %c2_42 = arith.constant 2 : index
    %157 = memref.load %arg5[%c2_42] : memref<20xf32, #tpu.memory_space<smem>>
    %158 = arith.subf %157, %156 : f32
    %159 = vector.broadcast %158 : f32 to vector<1x128xf32>
    %160 = arith.mulf %159, %13 : vector<1x128xf32>
    %161 = vector.broadcast %156 : f32 to vector<1x128xf32>
    %162 = arith.addf %161, %160 : vector<1x128xf32>
    %163 = vector.broadcast %162 : vector<1x128xf32> to vector<24x128xf32>
    %164 = arith.mulf %163, %155 : vector<24x128xf32>
    %165 = arith.addf %143, %164 : vector<24x128xf32>
    %c15_43 = arith.constant 15 : index
    %166 = memref.load %arg5[%c15_43] : memref<20xf32, #tpu.memory_space<smem>>
    %c11_44 = arith.constant 11 : index
    %167 = memref.load %arg5[%c11_44] : memref<20xf32, #tpu.memory_space<smem>>
    %168 = arith.subf %167, %166 : f32
    %169 = vector.broadcast %168 : f32 to vector<1x128xf32>
    %170 = arith.mulf %169, %13 : vector<1x128xf32>
    %171 = vector.broadcast %166 : f32 to vector<1x128xf32>
    %172 = arith.addf %171, %170 : vector<1x128xf32>
    %173 = vector.broadcast %172 : vector<1x128xf32> to vector<24x128xf32>
    %174 = arith.mulf %173, %155 : vector<24x128xf32>
    %175 = arith.addf %153, %174 : vector<24x128xf32>
    %c7_45 = arith.constant 7 : index
    %176 = memref.load %arg5[%c7_45] : memref<20xf32, #tpu.memory_space<smem>>
    %c5_46 = arith.constant 5 : index
    %177 = memref.load %arg5[%c5_46] : memref<20xf32, #tpu.memory_space<smem>>
    %178 = arith.subf %177, %176 : f32
    %179 = vector.broadcast %178 : f32 to vector<1x128xf32>
    %180 = arith.mulf %179, %13 : vector<1x128xf32>
    %181 = vector.broadcast %176 : f32 to vector<1x128xf32>
    %182 = arith.addf %181, %180 : vector<1x128xf32>
    %183 = vector.broadcast %182 : vector<1x128xf32> to vector<24x128xf32>
    %184 = arith.mulf %183, %154 : vector<24x128xf32>
    %185 = arith.addf %165, %184 : vector<24x128xf32>
    %c16_47 = arith.constant 16 : index
    %186 = memref.load %arg5[%c16_47] : memref<20xf32, #tpu.memory_space<smem>>
    %c14_48 = arith.constant 14 : index
    %187 = memref.load %arg5[%c14_48] : memref<20xf32, #tpu.memory_space<smem>>
    %188 = arith.subf %187, %186 : f32
    %189 = vector.broadcast %188 : f32 to vector<1x128xf32>
    %190 = arith.mulf %189, %13 : vector<1x128xf32>
    %191 = vector.broadcast %186 : f32 to vector<1x128xf32>
    %192 = arith.addf %191, %190 : vector<1x128xf32>
    %193 = vector.broadcast %192 : vector<1x128xf32> to vector<24x128xf32>
    %194 = arith.mulf %193, %154 : vector<24x128xf32>
    %195 = arith.addf %175, %194 : vector<24x128xf32>
    %c127_i32_49 = arith.constant 127 : i32
    %196 = tpu.dynamic_rotate %154 by %c127_i32_49 dim 1 : vector<24x128xf32>, i32 -> vector<24x128xf32>
    %c8 = arith.constant 8 : index
    %197 = memref.load %arg5[%c8] : memref<20xf32, #tpu.memory_space<smem>>
    %198 = vector.broadcast %197 : f32 to vector<24x128xf32>
    %199 = arith.mulf %198, %196 : vector<24x128xf32>
    %200 = arith.addf %185, %199 : vector<24x128xf32>
    %c17 = arith.constant 17 : index
    %201 = memref.load %arg5[%c17] : memref<20xf32, #tpu.memory_space<smem>>
    %202 = vector.broadcast %201 : f32 to vector<24x128xf32>
    %203 = arith.mulf %202, %196 : vector<24x128xf32>
    %204 = arith.addf %195, %203 : vector<24x128xf32>
    %cst_50 = arith.constant 0.000000e+00 : f32
    %205 = vector.broadcast %cst_50 : f32 to vector<24x128xf32>
    %c18 = arith.constant 18 : index
    %206 = memref.load %arg5[%c18] : memref<20xf32, #tpu.memory_space<smem>>
    %cst_51 = arith.constant 0.000000e+00 : f32
    %207 = vector.broadcast %cst_51 : f32 to vector<24x128xf32>
    %208 = arith.maximumf %200, %207 : vector<24x128xf32>
    %209 = vector.broadcast %206 : f32 to vector<24x128xf32>
    %210 = arith.mulf %209, %208 : vector<24x128xf32>
    %211 = arith.addf %205, %210 : vector<24x128xf32>
    %c19 = arith.constant 19 : index
    %212 = memref.load %arg5[%c19] : memref<20xf32, #tpu.memory_space<smem>>
    %cst_52 = arith.constant 0.000000e+00 : f32
    %213 = vector.broadcast %cst_52 : f32 to vector<24x128xf32>
    %214 = arith.maximumf %204, %213 : vector<24x128xf32>
    %215 = vector.broadcast %212 : f32 to vector<24x128xf32>
    %216 = arith.mulf %215, %214 : vector<24x128xf32>
    %217 = arith.addf %211, %216 : vector<24x128xf32>
    %218 = arith.negf %217 : vector<24x128xf32>
    %219 = math.exp %218 : vector<24x128xf32>
    %cst_53 = arith.constant 1.000000e+00 : f32
    %220 = vector.broadcast %cst_53 : f32 to vector<24x128xf32>
    %221 = arith.addf %220, %219 : vector<24x128xf32>
    %222 = arith.divf %220, %221 : vector<24x128xf32>
    %c0_54 = arith.constant 0 : index
    %c0_55 = arith.constant 0 : index
    %223 = vector.load %arg7[%c0_54, %c0_55] : memref<24x128xf32, #tpu.memory_space<vmem>>, vector<24x128xf32>
    tpu.vector_store %arg7[%c0_54, %c0_55], %222 {strides = array<i32>} : memref<24x128xf32, #tpu.memory_space<vmem>>, vector<24x128xf32>,
    %c0_56 = arith.constant 0 : index
    %c0_57 = arith.constant 0 : index
    %224 = vector.load %arg7[%c0_56, %c0_57] : memref<24x128xf32, #tpu.memory_space<vmem>>, vector<16x16xf32>
    %c0_58 = arith.constant 0 : index
    %c24_59 = arith.constant 24 : index
    %225 = vector.load %arg7[%c0_58, %c24_59] : memref<24x128xf32, #tpu.memory_space<vmem>>, vector<8x40xf32>
    %cst_60 = arith.constant dense<0.000000e+00> : vector<8x256xf32>
    %226 = tpu.matmul %225, %3, %cst_60 {dimension_numbers = #tpu.dot_dimension_numbers<[1], [0], [0], [1], [0, 0, 1, 1], [], []>} : vector<8x40xf32>, vector<40x256xf32>, vector<8x256xf32> -> vector<8x256xf32>
    %cst_61 = arith.constant dense<0.000000e+00> : vector<16x256xf32>
    %227 = tpu.matmul %224, %4, %cst_61 {dimension_numbers = #tpu.dot_dimension_numbers<[1], [0], [0], [1], [0, 0, 1, 1], [], []>} : vector<16x16xf32>, vector<16x256xf32>, vector<16x256xf32> -> vector<16x256xf32>
    %228 = arith.mulf %5, %227 : vector<16x256xf32>
    %cst_62 = arith.constant dense<0.000000e+00> : vector<256xf32>
    %229 = vector.multi_reduction <add>, %228, %cst_62 [0] : vector<16x256xf32> to vector<256xf32>
    %230 = vector.shape_cast %229 : vector<256xf32> to vector<1x256xf32>
    %cst_63 = arith.constant 1.000000e+00 : f32
    %231 = vector.broadcast %cst_63 : f32 to vector<1x256xf32>
    %232 = arith.addf %231, %230 : vector<1x256xf32>
    %233 = vector.broadcast %232 : vector<1x256xf32> to vector<8x256xf32>
    %234 = arith.addf %233, %226 : vector<8x256xf32>
    %235 = arith.mulf %36, %234 : vector<8x256xf32>
    %236 = arith.negf %235 : vector<8x256xf32>
    %237 = math.exp %236 : vector<8x256xf32>
    %cst_64 = arith.constant 1.000000e+00 : f32
    %238 = vector.broadcast %cst_64 : f32 to vector<8x256xf32>
    %239 = arith.addf %238, %237 : vector<8x256xf32>
    %240 = arith.divf %238, %239 : vector<8x256xf32>
    %c0_65 = arith.constant 0 : index
    %c0_66 = arith.constant 0 : index
    %c0_67 = arith.constant 0 : index
    %241 = vector.load %arg6[%c0_65, %c0_66, %c0_67] : memref<1x8x256xf32, #tpu.memory_space<vmem>>, vector<1x8x256xf32>
    %242 = vector.shape_cast %241 : vector<1x8x256xf32> to vector<8x256xf32>
    %243 = vector.shape_cast %240 : vector<8x256xf32> to vector<1x8x256xf32>
    tpu.vector_store %arg6[%c0_65, %c0_66, %c0_67], %243 {strides = array<i32>} : memref<1x8x256xf32, #tpu.memory_space<vmem>>, vector<1x8x256xf32>,
    return
  }
  func.func @transform_0(%arg0: i32) -> (i32, i32, i32) {
    %c0_i32 = arith.constant 0 : i32
    %c0_i32_0 = arith.constant 0 : i32
    %c0_i32_1 = arith.constant 0 : i32
    return %arg0, %c0_i32, %c0_i32_0 : i32, i32, i32
  }
  func.func @transform_1(%arg0: i32) -> (i32, i32) {
    %c0_i32 = arith.constant 0 : i32
    %c0_i32_0 = arith.constant 0 : i32
    %c0_i32_1 = arith.constant 0 : i32
    return %c0_i32, %c0_i32_0 : i32, i32
  }
  func.func @transform_2(%arg0: i32) -> (i32, i32) {
    %c0_i32 = arith.constant 0 : i32
    %c0_i32_0 = arith.constant 0 : i32
    %c0_i32_1 = arith.constant 0 : i32
    return %c0_i32, %c0_i32_0 : i32, i32
  }
  func.func @transform_3(%arg0: i32) -> (i32, i32) {
    %c0_i32 = arith.constant 0 : i32
    %c0_i32_0 = arith.constant 0 : i32
    %c0_i32_1 = arith.constant 0 : i32
    return %c0_i32, %c0_i32_0 : i32, i32
  }
  func.func @transform_4(%arg0: i32) -> i32 {
    %c0_i32 = arith.constant 0 : i32
    %c0_i32_0 = arith.constant 0 : i32
    return %c0_i32 : i32
  }
  func.func @transform_5(%arg0: i32) -> (i32, i32, i32) {
    %c0_i32 = arith.constant 0 : i32
    %c0_i32_0 = arith.constant 0 : i32
    %c0_i32_1 = arith.constant 0 : i32
    return %arg0, %c0_i32, %c0_i32_0 : i32, i32, i32
  }
}

</mosaic_0001>

<bundles_post_ra>
// kernel: daab_forward.1
= control target key start
LH: loop header
LB: loop body
LE: loop exit
PB: predicated region body
PF: predicated region fallthrough
CT: control target
= control target key end

     0   :  { %s1791_s0 = inlined_call_operand.vmem [shape: f32[2,8,256], index: 0, kind: input, shape index: {}]   ;;  %s1792_s1 = inlined_call_operand.vmem [shape: f32[8,2], index: 1, kind: input, shape index: {}]   ;;  %s1793_s2 = inlined_call_operand.vmem [shape: f32[256,40], index: 2, kind: input, shape index: {}]   ;;  %s1794_s3 = inlined_call_operand.vmem [shape: f32[40,256], index: 3, kind: input, shape index: {}]   ;;  %s1795_s4 = inlined_call_operand.vmem [shape: f32[20], index: 4, kind: input, shape index: {}]   ;;  %s1796_s5 = inlined_call_operand.vmem [shape: f32[2,8,256], index: 5, kind: output, shape index: {}]  }
   0x1   :  { %1800 = sst [smem:[#allocation6_spill]] %s1791_s0 }
   0x2   :  { %1801 = sst [smem:[#allocation7_spill]] %s1792_s1 }
   0x3   :  { %10 = vsyncpa [#allocation4], 0  ;;  %s1293_s18 = smov 0  }
   0x4 LB: > { %s1062_s19 = sadd.s32 4294967295, %s1253_s18   ;;  %p1064_p0 = scmp.ge.s32.totalorder %s1253_s18, 1  ;;  %s1253_s18 = sphi %s1293_s18, %s16_s18  }
   0x5   : > { %p157_p1 = scmp.lt.s32.totalorder %s1253_s18, 3  ;;  %s179_s22 = sshll.u32 %s1795_s4, 4  ;;  %s180_s22 = int_to_ptr.vmem [resolvable:$true] %s179_s22 }
   0x6   : > { %p1186_p3 = scmp.eq.s32.totalorder %s1062_s19, 0  ;;  %s1228_s24 = scalar_lea.vmem %s180_s22, 16 }
   0x7   : > { %p1304_p2 = pnand %p1064_p0, %p157_p1  ;;  %p1229_p6 = scmp.ne.s32.totalorder %s180_s22, %s1228_s24 }
   0x8   : > { %p1236_p10 = scmp.lt.s32.totalorder %s180_s22, %s180_s22  ;;  %p1237_p11 = scmp.lt.s32.totalorder %s1228_s24, %s1228_s24 }
   0x9   : > { %p1182_p4 = pneg %p1304_p2 }
   0xa   : > { %p1238_p12 = por %p1237_p11, %p1236_p10 }
   0xb   : > { %p1183_p5 = pnand %p1186_p3, %p1182_p4 }
   0xd   : > { %p1230_p7 = pneg %p1183_p5 }
   0xf   : > { %p1231_p8 = pnand %p1230_p7, %p1229_p6 }
  0x11   : > { %p1232_p9 = pneg %p1231_p8 }
  0x13   : > { %p1239_p13 = pnand %p1238_p12, %p1232_p9 }
  0x15   : > { %1242 = shalt.err (!%p1239_p13)
}
  0x16   : > { %s1255_s25 = smov [#allocation3]   ;;  %200 = sbr.rel (%p1304_p2) target bundleno = 1434 (0x59a), region = 40 }
  0x17   : > { %1185 = dma.vmem_to_smem (!%p1183_p5), %s180_s22, 16, %s1255_s25, [#allocation4]  }
  0x1b   : > { %1248 = dma.done.wait (%p1186_p3), [#allocation4], 16  }
  0x1c   : > { %1250 = vsyncadd (%p1186_p3), [#allocation4], 4294967280 }
  0x1d   : > { %206 = sfence }
  0x1e   : > { %p229_p0 = scmp.lt.s32.totalorder %s1062_s19, 1  ;;  %s1803_s0 = sld [smem:[#allocation6_spill]]  ;;  %v1256_v10 = vmov 0   ;;  %v1257_v14 = vmov 1   ;;  %v271_v19 = vld [vmem:[%s1793_s2 + $0xf8] sm:$0xff]  ;;  %v270_v21 = vld [vmem:[%s1793_s2 + $0xf0] sm:$0xff] }
  0x1f   : > { %1204 = vset.pattern.permute.xlu1 %v1256_v10  ;;  %1205 = vset.pattern.permute.xlu0 %v1257_v14  ;;  %s1804_s1 = sld [smem:[#allocation7_spill]]  ;;  %s1258_s7 = smov 1   ;;  %v255_v20 = vld [vmem:[%s1793_s2 + $0x78] sm:$0xff]  ;;  %v254_v22 = vld [vmem:[%s1793_s2 + $0x70] sm:$0xff]  ;;  %v269_v23 = vld [vmem:[%s1793_s2 + $0xe8] sm:$0xff]  ;;  %vm497_vm0 = vcmask 130048  }
  0x20   : > { %s1808_s19 = smov (!%p229_p0, %s1062_s19), 1  ;;  %1105 = vmatprep.subr.mxu0 %v271_v19  ;;  %1140 = vmatprep.subr.mxu1 %v271_v19  ;;  %v253_v24 = vld [vmem:[%s1793_s2 + $0x68] sm:$0xff]  ;;  %v268_v25 = vld [vmem:[%s1793_s2 + $0xe0] sm:$0xff]  ;;  %v267_v27 = vld [vmem:[%s1793_s2 + $0xd8] sm:$0xff]  ;;  %s1260_s17 = smov 24   ;;  %vm504_vm2 = vcmask 523456  }
  0x21   : > { %s1797_s26 = sshll.u32 %s1808_s19, 4  ;;  %1106 = vmatpush3.msra.mxu0 %v255_v20  ;;  %1141 = vmatpush3.msra.mxu1 %v255_v20  ;;  %v252_v26 = vld [vmem:[%s1793_s2 + $0x60] sm:$0xff]  ;;  %v251_v28 = vld [vmem:[%s1793_s2 + $0x58] sm:$0xff]  ;;  %v266_v29 = vld [vmem:[%s1793_s2 + $0xd0] sm:$0xff]  ;;  %s1798_s20 = smov 127   ;;  %vm801_vm7 = vcmask 326656  }
  0x22   : > { %1107 = vmatprep.subr.mxu0 %v270_v21  ;;  %1142 = vmatprep.subr.mxu1 %v270_v21  ;;  %v250_v30 = vld [vmem:[%s1793_s2 + $0x50] sm:$0xff]  ;;  %v265_v31 = vld [vmem:[%s1793_s2 + $0xc8] sm:$0xff]  ;;  %v264_v33 = vld [vmem:[%s1793_s2 + $0xc0] sm:$0xff]  ;;  %s1558_s10 = sld [smem:[#allocation3 + $0x5]] }
  0x23   : > { %1108 = vmatpush3.msra.mxu0 %v254_v22  ;;  %1143 = vmatpush3.msra.mxu1 %v254_v22  ;;  %v249_v32 = vld [vmem:[%s1793_s2 + $0x48] sm:$0xff]  ;;  %v248_v34 = vld [vmem:[%s1793_s2 + $0x40] sm:$0xff]  ;;  %v263_v35 = vld [vmem:[%s1793_s2 + $0xb8] sm:$0xff]  ;;  %s1560_s11 = sld [smem:[#allocation3 + $0x7]] }
  0x24   : > { %s233_s29 = scalar_lea.vmem %s1803_s0, %s1797_s26  ;;  %1109 = vmatprep.subr.mxu0 %v269_v23  ;;  %1144 = vmatprep.subr.mxu1 %v269_v23  ;;  %v247_v36 = vld [vmem:[%s1793_s2 + $0x38] sm:$0xff]  ;;  %v262_v37 = vld [vmem:[%s1793_s2 + $0xb0] sm:$0xff]  ;;  %v261_v39 = vld [vmem:[%s1793_s2 + $0xa8] sm:$0xff]  ;;  %s1564_s12 = sld [smem:[#allocation3 + $0x3]] }
  0x25   : > { %v1323_v0 = vld [vmem:[%s233_s29] sm:$0xff]  ;;  %v1325_v1 = vld [vmem:[%s233_s29 + $0x8] sm:$0xff]  ;;  %1110 = vmatpush3.msra.mxu0 %v253_v24  ;;  %1145 = vmatpush3.msra.mxu1 %v253_v24  ;;  %v246_v38 = vld [vmem:[%s1793_s2 + $0x30] sm:$0xff]  ;;  %s1566_s13 = sld [smem:[#allocation3 + $0xa]] }
  0x26   : > { %v295_v2 = vadd.f32 %v1325_v1, %v1323_v0  ;;  %v1334_v15 = vld [vmem:[%s1804_s1] sm:$0xff]  ;;  %1111 = vmatprep.subr.mxu0 %v268_v25  ;;  %1146 = vmatprep.subr.mxu1 %v268_v25  ;;  %v245_v40 = vld [vmem:[%s1793_s2 + $0x28] sm:$0xff]  ;;  %v259_v43 = vld [vmem:[%s1793_s2 + $0x98] sm:$0xff]  ;;  %s1568_s14 = sld [smem:[#allocation3 + $0xc]] }
  0x27   : > { %1112 = vmatpush3.msra.mxu0 %v252_v26  ;;  %1147 = vmatpush3.msra.mxu1 %v252_v26  ;;  %v260_v41 = vld [vmem:[%s1793_s2 + $0xa0] sm:$0xff]  ;;  %v243_v44 = vld [vmem:[%s1793_s2 + $0x18] sm:$0xff]  ;;  %v258_v45 = vld [vmem:[%s1793_s2 + $0x90] sm:$0xff]  ;;  %s1570_s15 = sld [smem:[#allocation3 + $0xe]] }
  0x28   : > { %296 = vadd.xlane.f32.xlu0 %v295_v2  ;;  %1113 = vmatprep.subr.mxu0 %v267_v27  ;;  %v244_v42 = vld [vmem:[%s1793_s2 + $0x20] sm:$0xff]  ;;  %v242_v46 = vld [vmem:[%s1793_s2 + $0x10] sm:$0xff]  ;;  %v257_v47 = vld [vmem:[%s1793_s2 + $0x88] sm:$0xff]  ;;  %s1572_s16 = sld [smem:[#allocation3 + $0x10]] }
  0x29   : > { %1114 = vmatpush3.msra.mxu0 %v251_v28  ;;  %1148 = vmatprep.subr.mxu1 %v267_v27  ;;  %v241_v48 = vld [vmem:[%s1793_s2 + $0x8] sm:$0xff]  ;;  %v256_v49 = vld [vmem:[%s1793_s2 + $0x80] sm:$0xff]  ;;  %v1467_v2 = vld [vmem:[%s1794_s3 + $0x30] sm:$0xff]  ;;  %v286_v27 = vlaneseq  ;;  %s1580_s23 = sld [smem:[#allocation3 + $0x2]] }
  0x2a   : > { %1115 = vmatprep.subr.mxu0 %v266_v29  ;;  %1149 = vmatpush3.msra.mxu1 %v251_v28  ;;  %v240_v51 = vld [vmem:[%s1793_s2] sm:$0xff]  ;;  %v1438_v53 = vld [vmem:[%s1794_s3 + $0x48] sm:$0xff]  ;;  %s1583_s24 = sld [smem:[#allocation3 + $0x6]] }
  0x2b   : > { %1116 = vmatpush3.msra.mxu0 %v250_v30  ;;  %1150 = vmatprep.subr.mxu1 %v266_v29  ;;  %v1454_v62 = vld [vmem:[%s1794_s3 + $0x40] sm:$0xff]  ;;  %v513_v28 = vshrl.u32 %v286_v27, 7  ;;  %s1585_s25 = sld [smem:[#allocation3 + $0xb]] }
  0x2c   : > { %1117 = vmatprep.subr.mxu0 %v265_v31  ;;  %1151 = vmatpush3.msra.mxu1 %v250_v30  ;;  %s555_s22 = ssub.f32 %s1568_s14, %s1566_s13 }
  0x2d   : > { %1118 = vmatpush3.msra.mxu0 %v249_v32  ;;  %1152 = vmatprep.subr.mxu1 %v265_v31  ;;  %vm677_vm1 = vcmp.lt.s32.totalorder %v513_v28, 7  ;;  %vm514_vm3 = vcmp.lt.s32.totalorder %v513_v28, 1  ;;  %s1587_s27 = sld [smem:[#allocation3 + $0xf]] }
  0x2e   : > { %1119 = vmatprep.subr.mxu0 %v264_v33  ;;  %1153 = vmatpush3.msra.mxu1 %v249_v32  ;;  %s615_s29 = ssub.f32 %s1566_s13, %s1568_s14 }
  0x2f   : > { %1120 = vmatpush3.msra.mxu0 %v248_v34  ;;  %1154 = vmatprep.subr.mxu1 %v264_v33  ;;  %s524_s30 = sld [smem:[#allocation3]] }
  0x30   : > { %1121 = vmatprep.subr.mxu0 %v263_v35  ;;  %1155 = vmatpush3.msra.mxu1 %v248_v34  ;;  %s1074_s6 = sld [smem:[#allocation3 + $0x9]] }
  0x31   : > { %1122 = vmatpush3.msra.mxu0 %v247_v36  ;;  %1156 = vmatprep.subr.mxu1 %v263_v35  ;;  %s574_s8 = ssub.f32 %s1583_s24, %s1580_s23 }
  0x32   : > { %1123 = vmatprep.subr.mxu0 %v262_v37  ;;  %1157 = vmatpush3.msra.mxu1 %v247_v36  ;;  %s687_s26 = ssub.f32 %s1580_s23, %s1583_s24 }
  0x33   : > { %1124 = vmatpush3.msra.mxu0 %v246_v38  ;;  %1158 = vmatprep.subr.mxu1 %v262_v37  ;;  %s587_s9 = ssub.f32 %s1587_s27, %s1585_s25 }
  0x34   : > { %1125 = vmatprep.subr.mxu0 %v261_v39  ;;  %1159 = vmatpush3.msra.mxu1 %v246_v38  ;;  %s663_s0 = ssub.f32 %s1572_s16, %s1570_s15 }
  0x35   : > { %1126 = vmatpush3.msra.mxu0 %v245_v40  ;;  %1160 = vmatprep.subr.mxu1 %v261_v39  ;;  %s698_s1 = ssub.f32 %s1585_s25, %s1587_s27 }
  0x36   : > { %1127 = vmatprep.subr.mxu0 %v260_v41  ;;  %1161 = vmatpush3.msra.mxu1 %v245_v40 }
  0x37   : > { %1128 = vmatpush3.msra.mxu0 %v244_v42  ;;  %1162 = vmatprep.subr.mxu1 %v260_v41 }
  0x38   : > { %1129 = vmatprep.subr.mxu0 %v259_v43  ;;  %1163 = vmatpush3.msra.mxu1 %v244_v42 }
  0x39   : > { %1130 = vmatpush3.msra.mxu0 %v243_v44  ;;  %1164 = vmatprep.subr.mxu1 %v259_v43  ;;  %v285_v43 = vld [vmem:[%s1794_s3 + $0x18] sm:$0xff] }
  0x3a   : > { %1131 = vmatprep.subr.mxu0 %v258_v45  ;;  %1165 = vmatpush3.msra.mxu1 %v243_v44  ;;  %v284_v44 = vld [vmem:[%s1794_s3 + $0x10] sm:$0xff] }
  0x3b   : > { %1132 = vmatpush3.msra.mxu0 %v242_v46  ;;  %1166 = vmatprep.subr.mxu1 %v258_v45  ;;  %v283_v45 = vld [vmem:[%s1794_s3 + $0x8] sm:$0xff] }
  0x3c   : > { %1133 = vmatprep.subr.mxu0 %v257_v47  ;;  %1167 = vmatpush3.msra.mxu1 %v242_v46  ;;  %v282_v46 = vld [vmem:[%s1794_s3] sm:$0xff] }
  0x3d   : > { %1168 = vmatprep.subr.mxu1 %v257_v47  ;;  %1134 = vmatpush3.msra.mxu0 %v241_v48 }
  0x3e   : > { %1169 = vmatpush3.msra.mxu1 %v241_v48  ;;  %1135 = vmatprep.subr.mxu0 %v256_v49  ;;  %v277_v48 = vld [vmem:[%s1794_s3 + $0x28] sm:$0xff] }
  0x3f   : > { %1170 = vmatprep.subr.mxu1 %v256_v49  ;;  %1136 = vmatpush3.msra.mxu0 %v240_v51  ;;  %v276_v49 = vld [vmem:[%s1794_s3 + $0x20] sm:$0xff] }
  0x40   : > { %1171 = vmatpush3.msra.mxu1 %v240_v51  ;;  %826 = vmatprep.subr.mxu0 %v1438_v53 }
  0x41   : > { %908 = vmatprep.subr.mxu1 %v285_v43 }
  0xb1   : > { %v297_v3 = vpop.xlane.xlu0 %296 }
  0xb2   : > { %v299_v4 = vmul.f32 0.00390625, %v297_v3 }
  0xb4   : > { %v300_v5 = vsub.f32 %v1323_v0, %v299_v4  ;;  %v301_v6 = vsub.f32 %v1325_v1, %v299_v4 }
  0xb6   : > { %v302_v7 = vmul.f32 %v300_v5, %v300_v5  ;;  %v303_v8 = vmul.f32 %v301_v6, %v301_v6 }
  0xb8   : > { %v304_v9 = vadd.f32 %v303_v8, %v302_v7 }
  0xba   : > { %305 = vadd.xlane.f32.xlu0 %v304_v9 }
 0x143   : > { %v306_v11 = vpop.xlane.xlu0 %305 }
 0x144   : > { %v307_v12 = vmul.f32 0.00390625, %v306_v11 }
 0x146   : > { %v308_v13 = vadd.f32 1e-05, %v307_v12 }
 0x148   : > { %1206 = vrsqrt.f32 %v308_v13 }
 0x155   : > { %v1207_v16 = vpop.eup %1206 }
 0x156   : > { %v310_v17 = vmul.f32 %v1207_v16, %v1334_v15 }
 0x158   : > { %v311_v18 = vmul.f32 %v310_v17, %v299_v4 }
 0x15a   : > { %313 = vrot.lane.b32.xlu1 %v311_v18, %s1258_s7 }
 0x15e   : > { %319 = vperm.xlu1 %1204, %v310_v17   ;;  %v1259_v17 = vmov 0.0  }
 0x15f   : > { %495 = vst [vmem:[#allocation2 + $0x8] sm:$0xff] %v1259_v17  ;;  %494 = vst [vmem:[#allocation2] sm:$0xff] %v1259_v17  ;;  %v676_v29 = vrot.slane %v1259_v17, 1  ;;  %v511_v36 = vrot.slane %v1259_v17, 7 }
 0x1cc   : > { %v314_v50 = vpop.permute.xlu1 %313 }
 0x1cd   : > { %v316_v52 = vsub.f32 %v1334_v15, %v314_v50  ;;  %v287_v50 = vand.u32 127, %v286_v27 }
 0x1cf   : > { %326 = vperm.xlu0 %1205, %v316_v52   ;;  %vm288_vm4 = vcmp.ge.s32.totalorder %v287_v50, 48  ;;  %vm289_vm5 = vcmp.lt.s32.totalorder %v287_v50, 64 }
 0x1d0   : > { %vm290_vm6 = vmand %vm288_vm4, %vm289_vm5 }
 0x1d1   : > { %v1598_v51 = vsel %vm290_vm6, 1.0, %v1259_v17 }
 0x1d9   : > { %v320_v54 = vpop.permute.xlu1 %319 }
 0x1da   : > { %v322_v55 = vmul.f32 %v320_v54, %v1323_v0  ;;  %v323_v56 = vmul.f32 %v320_v54, %v1325_v1  ;;  %v1460_v0 = vld [vmem:[%s1794_s3 + $0x38] sm:$0xff] }
 0x24a   : > { %v327_v57 = vpop.permute.xlu0 %326 }
 0x24b   : > { %v1443_v58 = vadd.f32 %v327_v57, %v322_v55  ;;  %v1445_v59 = vadd.f32 %v327_v57, %v323_v56  ;;  %v556_v55 = vstv %s555_s22  ;;  %v616_v57 = vstv %s615_s29 }
 0x24d   : > { %v401_v60 = vrot.slane %v1443_v58, 4  ;;  %395 = vmatprep.mubr.f32.mxu0 %v1445_v59  ;;  %v407_v61 = vrot.slane %v1445_v59, 4 }
 0x24e   : > { %396 = vmatmul.mubr.f32.vlgmr.msra.gmra.mxu0 %v1443_v58 }
 0x24f   : > { %v402_v63 = vadd.f32 %v401_v60, %v1443_v58  ;;  %v408_v1 = vadd.f32 %v407_v61, %v1445_v59  ;;  %827 = vmatpush1.msra.mxu0 %v1454_v62  ;;  %868 = vmatprep.mubr.f32.mxu0 %v1259_v17  ;;  %v575_v60 = vstv %s574_s8  ;;  %v588_v61 = vstv %s587_s9 }
 0x250   : > { %828 = vmatprep.subr.mxu0 %v1460_v0 }
 0x251   : > { %v409_v3 = vrot.slane %v408_v1, 2  ;;  %v403_v4 = vrot.slane %v402_v63, 2  ;;  %829 = vmatpush1.msra.mxu0 %v1467_v2 }
 0x252   : > { %830 = vmatprep.subr.mxu0 %v277_v48  ;;  %v690_v48 = vstv %s1583_s24 }
 0x253   : > { %v410_v5 = vadd.f32 %v409_v3, %v408_v1  ;;  %v404_v6 = vadd.f32 %v403_v4, %v402_v63  ;;  %831 = vmatpush1.msra.mxu0 %v276_v49 }
 0x254   : > { %832 = vmatprep.subr.mxu0 %v285_v43  ;;  %v666_v43 = vstv %s1570_s15 }
 0x255   : > { %v411_v7 = vrot.slane %v410_v5, 1  ;;  %v405_v8 = vrot.slane %v404_v6, 1  ;;  %833 = vmatpush1.msra.mxu0 %v284_v44 }
 0x256   : > { %834 = vmatprep.subr.mxu0 %v283_v45 }
 0x257   : > { %v412_v9 = vadd.f32 %v411_v7, %v410_v5  ;;  %v406_v10 = vadd.f32 %v405_v8, %v404_v6  ;;  %835 = vmatpush1.msra.mxu0 %v282_v46  ;;  %v557_v5 = vmul.f32 %v1598_v51, %v556_v55  ;;  %v558_v6 = vstv %s1566_s13  ;;  %s1638_s13 = sld [smem:[#allocation3 + $0xd]] }
 0x258   : > { %v617_v8 = vmul.f32 %v1598_v51, %v616_v57 }
 0x259   : > { %v414_v11 = vmul.f32 2.0, %v412_v9  ;;  %v413_v12 = vmul.f32 2.0, %v406_v10  ;;  %v576_v9 = vmul.f32 %v1598_v51, %v575_v60  ;;  %v589_v10 = vmul.f32 %v1598_v51, %v588_v61 }
 0x25b   : > { %v416_v13 = vmul.f32 %v414_v11, %v1460_v0  ;;  %v415_v14 = vmul.f32 %v413_v12, %v1467_v2  ;;  %v418_v15 = vmul.f32 %v414_v11, %v1438_v53  ;;  %v417_v16 = vmul.f32 %v413_v12, %v1454_v62 }
 0x25c   : > { %v1621_v11 = vstv %s524_s30  ;;  %v1623_v12 = vstv %s1074_s6 }
 0x25d   : > { %483 = vmatprep.mubr.f32.mxu1 %v416_v13  ;;  %v577_v13 = vstv %s1580_s23 }
 0x25e   : > { %484 = vmatmul.mubr.f32.vlgmr.msra.gmra.mxu1 %v415_v14  ;;  %v590_v14 = vstv %s1585_s25  ;;  %v1642_v27 = vadd.f32 %v577_v13, %v576_v9  ;;  %v1681_v9 = vstv %s1638_s13 }
 0x25f   : > { %488 = vmatprep.mubr.f32.mxu1 %v418_v15  ;;  %909 = vmatpush1.msra.mxu1 %v284_v44  ;;  %v607_v15 = vstv %s1564_s12  ;;  %v1644_v28 = vadd.f32 %v590_v14, %v589_v10  ;;  %v712_v44 = vstv %s1560_s11 }
 0x260   : > { %910 = vmatprep.subr.mxu1 %v283_v45 }
 0x261   : > { %911 = vmatpush1.msra.mxu1 %v282_v46 }
 0x262   : > { %489 = vmatmul.mubr.f32.gmra.mxu1 %v417_v16  ;;  %v618_v16 = vstv %s1568_s14 }
 0x263   : > { %944 = vmatprep.mubr.f32.mxu1 %v1259_v17 }
 0x30e   : > { %v1137_v18 = vpop.f32.mrf.mxu0 }
 0x310   : > { %v1138_v19 = vpop.f32.mrf.mxu0 }
 0x311   : > { %v1139_v20 = vadd.f32 %v1138_v19, %v1137_v18  ;;  %v664_v19 = vstv %s663_s0  ;;  %s1663_s0 = sld [smem:[#allocation3 + $0x8]] }
 0x313   : > { %501 = vrot.lane.b32.xlu1 %v1139_v20, %s1260_s17  ;;  %s709_s17 = ssub.f32 %s1558_s10, %s1560_s11  ;;  %v688_v20 = vstv %s687_s26 }
 0x314   : > { %v689_v46 = vmul.f32 %v1598_v51, %v688_v20  ;;  %s1091_s26 = sld [smem:[#allocation3 + $0x12]] }
 0x315   : > { %v710_v52 = vstv %s709_s17  ;;  %s720_s17 = ssub.f32 %s1570_s15, %s1572_s16 }
 0x316   : > { %v1605_v63 = vmul.f32 %v1598_v51, %v710_v52 }
 0x317   : > { %v721_v45 = vstv %s720_s17 }
 0x31e   : > { %v1172_v21 = vpop.f32.mrf.mxu1 }
 0x320   : > { %v1173_v22 = vpop.f32.mrf.mxu1 }
 0x321   : > { %v1174_v23 = vadd.f32 %v1173_v22, %v1172_v21  ;;  %v699_v21 = vstv %s698_s1  ;;  %s1671_s1 = sld [smem:[#allocation3 + $0x11]] }
 0x322   : > { %v1175_v24 = vpop.f32.mrf.mxu1 }
 0x323   : > { %498 = vst.msk [vmem:[#allocation2] sm:$0xff] %vm497_vm0, %v1174_v23  ;;  %v1636_v23 = vadd.f32 %v558_v6, %v557_v5  ;;  %v722_v6 = vmul.f32 %v1598_v51, %v721_v45 }
 0x324   : > { %v1176_v25 = vpop.f32.mrf.mxu1 }
 0x325   : > { %v1177_v26 = vadd.f32 %v1176_v25, %v1175_v24 }
 0x327   : > { %499 = vst.msk [vmem:[#allocation2 + $0x8] sm:$0xff] %vm497_vm0, %v1177_v26 }
 0x32e   : > { %v1483_v30 = vld [vmem:[#allocation2 + $0x8] sm:$0xff] }
 0x32f   : > { %v675_v31 = vrot.slane %v1483_v30, 1  ;;  %v510_v40 = vrot.slane %v1483_v30, 7 }
 0x331   : > { %v1487_v32 = vsel %vm677_vm1, %v675_v31, %v676_v29  ;;  %v1529_v42 = vsel %vm514_vm3, %v510_v40, %v511_v36 }
 0x332   : > { %683 = vrot.lane.b32.xlu0 %v1487_v32, %s1258_s7 }
 0x385   : > { %v502_v33 = vpop.permute.xlu1 %501 }
 0x386   : > { %505 = vst.msk [vmem:[#allocation2] sm:$0xff] %vm504_vm2, %v502_v33 }
 0x38d   : > { %v1491_v34 = vld [vmem:[#allocation2] sm:$0xff] }
 0x38e   : > { %598 = vrot.lane.b32.xlu1 %v1491_v34, %s1258_s7  ;;  %v509_v35 = vrot.slane %v1491_v34, 7  ;;  %v674_v38 = vrot.slane %v1491_v34, 1 }
 0x390   : > { %v1498_v37 = vsel %vm514_vm3, %v511_v36, %v509_v35  ;;  %v1508_v39 = vsel %vm677_vm1, %v674_v38, %v675_v31  ;;  %v1516_v41 = vsel %vm514_vm3, %v509_v35, %v510_v40  ;;  %v1548_v47 = vsel %vm677_vm1, %v676_v29, %v674_v38 }
 0x391   : > { %v1648_v31 = vadd.f32 %v618_v16, %v617_v8  ;;  %v665_v35 = vmul.f32 %v1598_v51, %v664_v19  ;;  %v560_v38 = vmul.f32 %v1636_v23, %v1498_v37  ;;  %v653_v40 = vstv %s1558_s10 }
 0x392   : > { %518 = vrot.lane.b32.xlu1 %v1498_v37, %s1258_s7  ;;  %v636_v16 = vmul.f32 %v1681_v9, %v1491_v34 }
 0x393   : > { %v1669_v60 = vadd.f32 %v666_v43, %v665_v35 }
 0x396   : > { %566 = vrot.lane.b32.xlu1 %v1498_v37, %s1798_s20 }
 0x39a   : > { %642 = vrot.lane.b32.xlu1 %v1491_v34, %s1798_s20 }
 0x39e   : > { %681 = vrot.lane.b32.xlu1 %v1508_v39, %s1258_s7 }
 0x3a2   : > { %731 = vrot.lane.b32.xlu1 %v1508_v39, %s1798_s20 }
 0x3a6   : > { %520 = vrot.lane.b32.xlu1 %v1516_v41, %s1258_s7 }
 0x3aa   : > { %568 = vrot.lane.b32.xlu1 %v1516_v41, %s1798_s20 }
 0x3ae   : > { %600 = vrot.lane.b32.xlu1 %v1483_v30, %s1258_s7 }
 0x3b2   : > { %644 = vrot.lane.b32.xlu1 %v1483_v30, %s1798_s20 }
 0x3b6   : > { %733 = vrot.lane.b32.xlu1 %v1487_v32, %s1798_s20  ;;  %s650_s20 = ssub.f32 %s1560_s11, %s1558_s10  ;;  %s1262_s10 = smov 104  }
 0x3b7   : > { %s1805_s11 = smov 127  }
 0x3b8   : > { %v651_v18 = vstv %s650_s20  ;;  %s1092_s20 = sld [smem:[#allocation3 + $0x13]] }
 0x3b9   : > { %v652_v33 = vmul.f32 %v1598_v51, %v651_v18 }
 0x3ba   : > { %522 = vrot.lane.b32.xlu1 %v1529_v42, %s1258_s7 }
 0x3bb   : > { %v1667_v57 = vadd.f32 %v653_v40, %v652_v33  ;;  %v1704_v40 = vstv %s1671_s1 }
 0x3be   : > { %602 = vrot.lane.b32.xlu1 %v1259_v17, %s1258_s7 }
 0x3c2   : > { %685 = vrot.lane.b32.xlu1 %v1548_v47, %s1258_s7  ;;  %s1562_s7 = sld [smem:[#allocation3 + $0x1]] }
 0x3c8   : > { %s542_s21 = ssub.f32 %s1564_s12, %s1562_s7  ;;  %v545_v4 = vstv %s1562_s7 }
 0x3c9   : > { %s604_s28 = ssub.f32 %s1562_s7, %s1564_s12  ;;  %s1806_s12 = sshll.u32 %s1808_s19, 4 }
 0x3ca   : > { %v543_v54 = vstv %s542_s21  ;;  %s1629_s7 = sld [smem:[#allocation3 + $0x4]] }
 0x3cb   : > { %v605_v56 = vstv %s604_s28  ;;  %v544_v3 = vmul.f32 %v1598_v51, %v543_v54 }
 0x3cc   : > { %v606_v7 = vmul.f32 %v1598_v51, %v605_v56  ;;  %v701_v56 = vstv %s1587_s27 }
 0x3cd   : > { %v1634_v22 = vadd.f32 %v545_v4, %v544_v3 }
 0x3ce   : > { %v1646_v29 = vadd.f32 %v607_v15, %v606_v7  ;;  %v723_v7 = vstv %s1572_s16  ;;  %s238_s16 = scalar_lea.vmem %s1796_s5, %s1806_s12 }
 0x3cf   : > { %v547_v36 = vmul.f32 %v1634_v22, %v1498_v37  ;;  %v700_v37 = vmul.f32 %v1598_v51, %v699_v21 }
 0x3d0   : > { %v1678_v8 = vstv %s1629_s7 }
 0x3d1   : > { %v628_v15 = vmul.f32 %v1678_v8, %v1491_v34  ;;  %v1689_v18 = vadd.f32 %v701_v56, %v700_v37  ;;  %v1712_v37 = vstv %s1091_s26  ;;  %v1714_v56 = vstv %s1092_s20 }
 0x400   : > { %v599_v1 = vpop.permute.xlu1 %598 }
 0x401   : > { %v609_v61 = vmul.f32 %v1646_v29, %v599_v1  ;;  %v620_v3 = vmul.f32 %v1648_v31, %v599_v1  ;;  %v1687_v1 = vadd.f32 %v690_v48, %v689_v46 }
 0x404   : > { %v519_v24 = vpop.permute.xlu1 %518 }
 0x405   : > { %v526_v25 = vmul.f32 %v1621_v11, %v519_v24  ;;  %v534_v26 = vmul.f32 %v1623_v12, %v519_v24  ;;  %v1694_v24 = vadd.f32 %v712_v44, %v1605_v63 }
 0x407   : > { %v550_v50 = vadd.f32 %v547_v36, %v526_v25  ;;  %v563_v52 = vadd.f32 %v560_v38, %v534_v26  ;;  %v1696_v25 = vadd.f32 %v723_v7, %v722_v6  ;;  %v1701_v38 = vstv %s1663_s0 }
 0x408   : > { %v567_v49 = vpop.permute.xlu1 %566  ;;  %v714_v43 = vmul.f32 %v1694_v24, %v1508_v39 }
 0x409   : > { %v579_v54 = vmul.f32 %v1642_v27, %v567_v49  ;;  %v592_v55 = vmul.f32 %v1644_v28, %v567_v49  ;;  %v725_v63 = vmul.f32 %v1696_v25, %v1508_v39 }
 0x40b   : > { %v582_v4 = vadd.f32 %v579_v54, %v550_v50  ;;  %v595_v5 = vadd.f32 %v592_v55, %v563_v52 }
 0x40c   : > { %v643_v10 = vpop.permute.xlu1 %642 }
 0x40d   : > { %v612_v13 = vadd.f32 %v609_v61, %v582_v4  ;;  %v623_v14 = vadd.f32 %v620_v3, %v595_v5  ;;  %v655_v20 = vmul.f32 %v1667_v57, %v643_v10  ;;  %v668_v21 = vmul.f32 %v1669_v60, %v643_v10 }
 0x40e   : > { %v548_v10 = vmul.f32 %v1634_v22, %v1516_v41 }
 0x40f   : > { %v631_v51 = vadd.f32 %v628_v15, %v612_v13  ;;  %v639_v19 = vadd.f32 %v636_v16, %v623_v14  ;;  %v561_v15 = vmul.f32 %v1636_v23, %v1516_v41  ;;  %v629_v41 = vmul.f32 %v1678_v8, %v1483_v30 }
 0x410   : > { %v682_v26 = vpop.permute.xlu1 %681 }
 0x411   : > { %v658_v34 = vadd.f32 %v655_v20, %v631_v51  ;;  %v671_v33 = vadd.f32 %v668_v21, %v639_v19  ;;  %v692_v35 = vmul.f32 %v1687_v1, %v682_v26  ;;  %v703_v36 = vmul.f32 %v1689_v18, %v682_v26 }
 0x413   : > { %v695_v44 = vadd.f32 %v692_v35, %v658_v34  ;;  %v706_v45 = vadd.f32 %v703_v36, %v671_v33 }
 0x414   : > { %v732_v46 = vpop.permute.xlu1 %731 }
 0x415   : > { %v717_v48 = vadd.f32 %v714_v43, %v695_v44  ;;  %v728_v49 = vadd.f32 %v725_v63, %v706_v45  ;;  %v739_v50 = vmul.f32 %v1701_v38, %v732_v46  ;;  %v747_v52 = vmul.f32 %v1704_v40, %v732_v46  ;;  %v684_v45 = vpop.permute.xlu0 %683 }
 0x416   : > { %v637_v44 = vmul.f32 %v1681_v9, %v1483_v30  ;;  %v726_v30 = vmul.f32 %v1696_v25, %v1487_v32 }
 0x417   : > { %v742_v54 = vadd.f32 %v739_v50, %v717_v48  ;;  %v750_v55 = vadd.f32 %v747_v52, %v728_v49 }
 0x418   : > { %v521_v61 = vpop.permute.xlu1 %520 }
 0x419   : > { %v754_v3 = vmax.f32 %v742_v54, 0.0  ;;  %v765_v4 = vmax.f32 %v750_v55, 0.0  ;;  %v527_v39 = vmul.f32 %v1621_v11, %v521_v61  ;;  %v535_v7 = vmul.f32 %v1623_v12, %v521_v61 }
 0x41a   : > { %v693_v54 = vmul.f32 %v1687_v1, %v684_v45  ;;  %v704_v55 = vmul.f32 %v1689_v18, %v684_v45 }
 0x41b   : > { %v758_v5 = vmul.f32 %v1712_v37, %v754_v3  ;;  %v769_v6 = vmul.f32 %v1714_v56, %v765_v4  ;;  %v551_v19 = vadd.f32 %v548_v10, %v527_v39  ;;  %v564_v21 = vadd.f32 %v561_v15, %v535_v7 }
 0x41c   : > { %v569_v13 = vpop.permute.xlu1 %568  ;;  %v715_v39 = vmul.f32 %v1694_v24, %v1487_v32 }
 0x41d   : > { %v772_v14 = vadd.f32 %v769_v6, %v758_v5  ;;  %v580_v16 = vmul.f32 %v1642_v27, %v569_v13  ;;  %v593_v51 = vmul.f32 %v1644_v28, %v569_v13 }
 0x41f   : > { %v1093_v20 = vmul.f32 -1.442695, %v772_v14  ;;  %v583_v26 = vadd.f32 %v580_v16, %v551_v19  ;;  %v596_v33 = vadd.f32 %v593_v51, %v564_v21 }
 0x420   : > { %v601_v34 = vpop.permute.xlu1 %600 }
 0x421   : > { %1208 = vpow2.f32 %v1093_v20  ;;  %v610_v35 = vmul.f32 %v1646_v29, %v601_v34  ;;  %v621_v36 = vmul.f32 %v1648_v31, %v601_v34 }
 0x423   : > { %v613_v43 = vadd.f32 %v610_v35, %v583_v26  ;;  %v624_v63 = vadd.f32 %v621_v36, %v596_v33 }
 0x424   : > { %v645_v46 = vpop.permute.xlu1 %644 }
 0x425   : > { %v632_v48 = vadd.f32 %v629_v41, %v613_v43  ;;  %v640_v49 = vadd.f32 %v637_v44, %v624_v63  ;;  %v656_v50 = vmul.f32 %v1667_v57, %v645_v46  ;;  %v669_v52 = vmul.f32 %v1669_v60, %v645_v46 }
 0x427   : > { %v659_v61 = vadd.f32 %v656_v50, %v632_v48  ;;  %v672_v3 = vadd.f32 %v669_v52, %v640_v49  ;;  %v549_v48 = vmul.f32 %v1634_v22, %v1529_v42  ;;  %v638_v22 = vmul.f32 0.0, %v1681_v9 }
 0x428   : > { %v734_v4 = vpop.permute.xlu1 %733  ;;  %v716_v9 = vmul.f32 %v1694_v24, %v1548_v47 }
 0x429   : > { %v696_v5 = vadd.f32 %v693_v54, %v659_v61  ;;  %v707_v6 = vadd.f32 %v704_v55, %v672_v3  ;;  %v740_v13 = vmul.f32 %v1701_v38, %v734_v4  ;;  %v748_v14 = vmul.f32 %v1704_v40, %v734_v4 }
 0x42b   : > { %v718_v7 = vadd.f32 %v715_v39, %v696_v5  ;;  %v729_v10 = vadd.f32 %v726_v30, %v707_v6  ;;  %v630_v39 = vmul.f32 0.0, %v1678_v8 }
 0x42c   : > { %v523_v41 = vpop.permute.xlu1 %522 }
 0x42d   : > { %v743_v15 = vadd.f32 %v740_v13, %v718_v7  ;;  %v751_v16 = vadd.f32 %v748_v14, %v729_v10  ;;  %v528_v44 = vmul.f32 %v1621_v11, %v523_v41  ;;  %v536_v45 = vmul.f32 %v1623_v12, %v523_v41 }
 0x42e   : > { %v1209_v51 = vpop.eup %1208 }
 0x42f   : > { %v784_v19 = vadd.f32 1.0, %v1209_v51  ;;  %v755_v20 = vmax.f32 %v743_v15, 0.0  ;;  %v766_v21 = vmax.f32 %v751_v16, 0.0  ;;  %v552_v49 = vadd.f32 %v549_v48, %v528_v44 }
 0x430   : > { %v603_v52 = vpop.permute.xlu1 %602 }
 0x431   : > { %1210 = vrcp.f32 %v784_v19  ;;  %v759_v26 = vmul.f32 %v1712_v37, %v755_v20  ;;  %v770_v34 = vmul.f32 %v1714_v56, %v766_v21  ;;  %v611_v55 = vmul.f32 %v1646_v29, %v603_v52 }
 0x432   : > { %v622_v61 = vmul.f32 %v1648_v31, %v603_v52 }
 0x433   : > { %v773_v32 = vadd.f32 %v770_v34, %v759_v26 }
 0x434   : > { %v686_v29 = vpop.permute.xlu1 %685 }
 0x435   : > { %v1094_v33 = vmul.f32 -1.442695, %v773_v32 }
 0x437   : > { %1212 = vpow2.f32 %v1094_v33 }
 0x43e   : > { %v1211_v35 = vpop.eup %1210 }
 0x43f   : > { %793 = vst [vmem:[#allocation2] sm:$0xff] %v1211_v35  ;;  %799 = vrot.lane.b32.xlu0 %v1211_v35, %s1262_s10  ;;  %1097 = vmatmul.mubr.msk.f32.vlgmr.msra.gmra.mxu1 %vm497_vm0, %v1211_v35 }
 0x440   : > { %950 = vmatprep.mubr.f32.mxu1 %v1259_v17 }
 0x443   : > { %570 = vrot.lane.b32.xlu0 %v1529_v42, %s1805_s11 }
 0x444   : > { %v1213_v36 = vpop.eup %1212 }
 0x445   : > { %v785_v43 = vadd.f32 1.0, %v1213_v36 }
 0x447   : > { %1214 = vrcp.f32 %v785_v43  ;;  %646 = vrot.lane.b32.xlu0 %v1259_v17, %s1805_s11  ;;  %v562_v17 = vmul.f32 %v1636_v23, %v1529_v42 }
 0x449   : > { %v565_v50 = vadd.f32 %v562_v17, %v536_v45 }
 0x44b   : > { %735 = vrot.lane.b32.xlu0 %v1548_v47, %s1805_s11 }
 0x454   : > { %v1215_v63 = vpop.eup %1214 }
 0x455   : > { %794 = vst [vmem:[#allocation2 + $0x8] sm:$0xff] %v1215_v63  ;;  %1098 = vmatmul.mubr.msk.f32.gmra.mxu1 %vm497_vm0, %v1215_v63 }
 0x4b1   : > { %v800_v46 = vpop.permute.xlu0 %799 }
 0x4b2   : > { %1096 = vmatmul.mubr.msk.f32.vlgmr.msra.gmra.mxu0 %vm801_vm7, %v800_v46 }
 0x4b5   : > { %v571_v54 = vpop.permute.xlu0 %570 }
 0x4b6   : > { %v581_v11 = vmul.f32 %v1642_v27, %v571_v54  ;;  %v594_v12 = vmul.f32 %v1644_v28, %v571_v54  ;;  %v694_v27 = vmul.f32 %v1687_v1, %v686_v29  ;;  %v705_v28 = vmul.f32 %v1689_v18, %v686_v29 }
 0x4b8   : > { %v584_v3 = vadd.f32 %v581_v11, %v552_v49  ;;  %v597_v4 = vadd.f32 %v594_v12, %v565_v50 }
 0x4b9   : > { %v647_v30 = vpop.permute.xlu0 %646 }
 0x4ba   : > { %v614_v42 = vadd.f32 %v611_v55, %v584_v3  ;;  %v625_v23 = vadd.f32 %v622_v61, %v597_v4  ;;  %v657_v5 = vmul.f32 %v1667_v57, %v647_v30  ;;  %v670_v6 = vmul.f32 %v1669_v60, %v647_v30 }
 0x4bb   : > { %v727_v57 = vmul.f32 %v1696_v25, %v1548_v47 }
 0x4bc   : > { %v633_v7 = vadd.f32 %v630_v39, %v614_v42  ;;  %v641_v31 = vadd.f32 %v638_v22, %v625_v23 }
 0x4bd   : > { %v736_v14 = vpop.permute.xlu0 %735 }
 0x4be   : > { %v660_v10 = vadd.f32 %v657_v5, %v633_v7  ;;  %v673_v13 = vadd.f32 %v670_v6, %v641_v31  ;;  %v741_v51 = vmul.f32 %v1701_v38, %v736_v14  ;;  %v749_v19 = vmul.f32 %v1704_v40, %v736_v14 }
 0x4c0   : > { %v697_v8 = vadd.f32 %v694_v27, %v660_v10  ;;  %v708_v15 = vadd.f32 %v705_v28, %v673_v13 }
 0x4c2   : > { %v719_v16 = vadd.f32 %v716_v9, %v697_v8  ;;  %v730_v60 = vadd.f32 %v727_v57, %v708_v15 }
 0x4c4   : > { %v744_v1 = vadd.f32 %v741_v51, %v719_v16  ;;  %v752_v20 = vadd.f32 %v749_v19, %v730_v60 }
 0x4c6   : > { %v756_v18 = vmax.f32 %v744_v1, 0.0  ;;  %v767_v21 = vmax.f32 %v752_v20, 0.0 }
 0x4c8   : > { %v760_v26 = vmul.f32 %v1712_v37, %v756_v18  ;;  %v771_v34 = vmul.f32 %v1714_v56, %v767_v21 }
 0x4ca   : > { %v774_v32 = vadd.f32 %v771_v34, %v760_v26 }
 0x4cc   : > { %v1095_v33 = vmul.f32 -1.442695, %v774_v32 }
 0x4ce   : > { %1216 = vpow2.f32 %v1095_v33 }
 0x4db   : > { %v1217_v24 = vpop.eup %1216 }
 0x4dc   : > { %v786_v35 = vadd.f32 1.0, %v1217_v24 }
 0x4de   : > { %1218 = vrcp.f32 %v786_v35 }
 0x4eb   : > { %v1219_v47 = vpop.eup %1218 }
 0x4ff   : > { %v946_v25 = vpop.f32.mrf.mxu1 }
 0x500   : > { %v957_v63 = vmul.f32 %v946_v25, %v1467_v2 }
 0x501   : > { %v948_v36 = vpop.f32.mrf.mxu1 }
 0x502   : > { %v958_v37 = vmul.f32 %v948_v36, %v1460_v0 }
 0x515   : > { %v952_v38 = vpop.f32.mrf.mxu1 }
 0x516   : > { %v959_v40 = vmul.f32 %v952_v38, %v1454_v62 }
 0x517   : > { %v954_v43 = vpop.f32.mrf.mxu1 }
 0x518   : > { %v960_v41 = vmul.f32 %v954_v43, %v1438_v53  ;;  %v961_v56 = vadd.f32 %v959_v40, %v957_v63 }
 0x51a   : > { %v968_v44 = vadd.f32 %v960_v41, %v958_v37  ;;  %v962_v45 = vrot.slane %v961_v56, 4 }
 0x51c   : > { %v969_v46 = vrot.slane %v968_v44, 4  ;;  %v963_v48 = vadd.f32 %v962_v45, %v961_v56 }
 0x51e   : > { %v970_v17 = vadd.f32 %v969_v46, %v968_v44  ;;  %v964_v49 = vrot.slane %v963_v48, 2 }
 0x520   : > { %v971_v50 = vrot.slane %v970_v17, 2  ;;  %v965_v52 = vadd.f32 %v964_v49, %v963_v48 }
 0x522   : > { %v972_v54 = vadd.f32 %v971_v50, %v970_v17  ;;  %v966_v55 = vrot.slane %v965_v52, 1 }
 0x524   : > { %v973_v61 = vrot.slane %v972_v54, 1  ;;  %v967_v11 = vadd.f32 %v966_v55, %v965_v52 }
 0x526   : > { %v974_v62 = vadd.f32 %v973_v61, %v972_v54  ;;  %v975_v12 = vadd.f32 1.0, %v967_v11 }
 0x528   : > { %v976_v53 = vadd.f32 1.0, %v974_v62 }
 0x572   : > { %v870_v2 = vpop.f32.mrf.mxu0 }
 0x573   : > { %v977_v3 = vadd.f32 %v975_v12, %v870_v2 }
 0x574   : > { %v872_v0 = vpop.f32.mrf.mxu0 }
 0x575   : > { %v979_v4 = vmul.f32 %v977_v3, %v1443_v58  ;;  %v978_v39 = vadd.f32 %v976_v53, %v872_v0 }
 0x577   : > { %v1099_v22 = vmul.f32 -1.442695, %v979_v4  ;;  %v980_v30 = vmul.f32 %v978_v39, %v1445_v59 }
 0x579   : > { %1220 = vpow2.f32 %v1099_v22  ;;  %v1100_v42 = vmul.f32 -1.442695, %v980_v30 }
 0x57b   : > { %1222 = vpow2.f32 %v1100_v42 }
 0x586   : > { %v1221_v23 = vpop.eup %1220 }
 0x587   : > { %v987_v5 = vadd.f32 1.0, %v1221_v23 }
 0x588   : > { %v1223_v6 = vpop.eup %1222 }
 0x589   : > { %1224 = vrcp.f32 %v987_v5  ;;  %v988_v29 = vadd.f32 1.0, %v1223_v6 }
 0x58b   : > { %1226 = vrcp.f32 %v988_v29 }
 0x596   : > { %v1225_v7 = vpop.eup %1224 }
 0x597   : > { %993 = vst [vmem:[%s238_s16] sm:$0xff] %v1225_v7 }
 0x598   : > { %v1227_v58 = vpop.eup %1226 }
 0x599   : > { %994 = vst [vmem:[%s238_s16 + $0x8] sm:$0xff] %v1227_v58 }
 0x59a PF: > { %s16_s18 = sadd.s32 1, %s1253_s18  }
 0x59b   : > { %p13_p1 = scmp.ge.s32.totalorder %s16_s18, 4  }
 0x59d   :  { %15 = sbr.rel (!%p13_p1) target bundleno = 4 (0x4), region = 75 }
 0x5a2   :  { %1016 = vsyncpa [#allocation4], 1 }
 0x5a3   :  { %1018 = vsyncpa [#allocation4 + $0x1], 1 }

</bundles_post_ra>
